<compile_context>
chip_gen: v7x
topology: tpu7x:2x2x1
jax: 0.10.0
libtpu: 0.0.40
codegen_flags: <defaults>
</compile_context>

<pallas_src>
import functools

import numpy as np
import jax
import jax.numpy as jnp
from jax.experimental import pallas as pl
from jax.experimental.pallas import tpu as pltpu

# ---------------- model hyper-parameters (small, synthetic) -----------------
MAXLEN = 16                      # params_local['MAXLEN']
ALPHABET = 8                     # "ss8" -> 8-state one-hot width
KERNELS_TUPLE = ((4, ALPHABET), (8, ALPHABET))
FILTERS = (16, 16)
TERMS_CLASSES = 32
FC_DEPTH = 2                     # "FC2"


# ----------------------------- fused Pallas kernel ---------------------------
def _fused_kernel(x_ref, wt_ref, fc_ref, out_ref, *,
                  kernels, filters, maxlen, w_off, w_rows, b_off):
    """Fused conv (block-Toeplitz matmul) + global max pool + FC head.

    x_ref : (B, MAXLEN*A)             flattened input (lane dense, one vreg row/sample)
    wt_ref: (MAXLEN*A, sum_i P_i*F_i) block-Toeplitz conv weight (all branches)
    fc_ref: (rows, TERMS)             packed FC weights + biases (8-aligned rows)
    out_ref: (B, TERMS)
    """
    # ---- every conv branch & every position in ONE K=128 MXU contraction ---
    conv = jnp.dot(x_ref[...], wt_ref[...],
                   preferred_element_type=jnp.float32)       # (B, sum_i P_i*F_i)

    # ---- per branch: global max pool + first-FC partial contraction --------
    # The branch concat is folded into the first FC layer algebraically:
    #   concat(p0, p1) @ W1 == p0 @ W1[:F0] + p1 @ W1[F0:]
    h = None
    col = 0
    frow = w_off[0]
    for (k, _a), f in zip(kernels, filters):
        p_cnt = maxlen - k + 1
        # log-depth maximum tree over the P_i positions (static lane slices,
        # all tile-interior since 16 | 128)
        segs = [conv[:, col + p * f: col + (p + 1) * f] for p in range(p_cnt)]
        while len(segs) > 1:
            nxt = [jnp.maximum(segs[i], segs[i + 1])
                   for i in range(0, len(segs) - 1, 2)]
            if len(segs) % 2:
                nxt.append(segs[-1])
            segs = nxt
        pooled = segs[0]                                      # (B, F_i), bias-free
        part = jnp.dot(pooled, fc_ref[frow:frow + f, :],
                       preferred_element_type=jnp.float32)
        h = part if h is None else h + part
        col += p_cnt * f
        frow += f
    h = h + fc_ref[b_off[0]:b_off[0] + 1, :]      # b1' (conv biases folded in)

    # ---- remaining FC layers + output layer ---------------------------------
    for li in range(1, len(w_off)):
        h = jnp.maximum(h, 0.0)                               # relu of previous layer
        h = jnp.dot(h, fc_ref[w_off[li]:w_off[li] + w_rows[li], :],
                    preferred_element_type=jnp.float32)
        h = h + fc_ref[b_off[li]:b_off[li] + 1, :]
    out_ref[...] = jax.nn.sigmoid(h)                          # single lane-dense store


# ------------------------- parameter preprocessing ---------------------------
def pack_params(params):
    """Build the fused kernel's two weight buffers + static slice layout.

    Done ONCE, off the hot path:
      * block-Toeplitz conv weight (all branches, all positions),
      * conv biases folded into the first FC/output bias,
      * all FC weights & biases packed into one (rows, TERMS) buffer with
        8-row-aligned offsets.
    """
    # 1) W_T[m*A + a, off_i + p*F + f] = w_i[f, 0, m - p, a]  (0 <= m-p < k)
    blocks = []
    for (k, a), f, (w, _b) in zip(KERNELS_TUPLE, FILTERS, params["convs"]):
        p_cnt = MAXLEN - k + 1
        w2 = np.asarray(w, np.float32).reshape(f, k * a).T    # (k*A, F), (t,a)-major
        blk = np.zeros((MAXLEN * a, p_cnt * f), np.float32)
        for p in range(p_cnt):
            blk[p * a:(p + k) * a, p * f:(p + 1) * f] = w2
        blocks.append(blk)
    w_toep = jnp.asarray(np.concatenate(blocks, axis=1))      # (MAXLEN*A, sum P_i*F_i)

    # 2) fold conv biases into the first FC (or output) bias:
    #    (max + b_conv) @ W1 + b1 == max @ W1 + (b_conv @ W1 + b1)
    first_w, first_b = (params["fc"][0] if FC_DEPTH > 0 else params["out"])
    b_conv = jnp.concatenate([b for _w, b in params["convs"]])
    first_b_folded = first_b + b_conv @ first_w

    ws = [first_w]
    bs = [first_b_folded]
    if FC_DEPTH > 0:
        for w, b in params["fc"][1:]:
            ws.append(w)
            bs.append(b)
        wo, bo = params["out"]
        ws.append(wo)
        bs.append(bo)

    # 3) pack everything into one buffer, biases on 8-aligned single rows
    pieces, w_off, w_rows = [], [], []
    row = 0
    for w in ws:
        w_off.append(row)
        w_rows.append(int(w.shape[0]))
        pieces.append(np.asarray(w, np.float32))
        row += int(w.shape[0])
    pad = (-row) % 8
    if pad:
        pieces.append(np.zeros((pad, TERMS_CLASSES), np.float32))
        row += pad
    b_off = []
    for b in bs:
        b_off.append(row)
        blk = np.zeros((8, TERMS_CLASSES), np.float32)
        blk[0, :] = np.asarray(b, np.float32)
        pieces.append(blk)
        row += 8
    fc_pack = jnp.asarray(np.concatenate(pieces, axis=0))     # (rows, TERMS)

    layout = dict(w_off=tuple(w_off), w_rows=tuple(w_rows), b_off=tuple(b_off))
    return w_toep, fc_pack, layout


# ------------------------------ wrapper ---------------------------------------
def model1_forward(x, w_toep, fc_pack, layout):
    """x: (B, MAXLEN, A) float32 (PyTorch's input before unsqueeze(1))."""
    B = x.shape[0]
    x_flat = x.reshape(B, MAXLEN * ALPHABET)    # free, contiguous HBM reinterpretation

    kernel = functools.partial(
        _fused_kernel,
        kernels=KERNELS_TUPLE,
        filters=FILTERS,
        maxlen=MAXLEN,
        **layout,
    )

    flops = 2 * B * x_flat.shape[1] * w_toep.shape[1]
    flops += 2 * B * sum(r * TERMS_CLASSES for r in layout["w_rows"])
    bytes_accessed = 4 * (x_flat.size + w_toep.size + fc_pack.size
                          + B * TERMS_CLASSES)

    return pl.pallas_call(
        kernel,
        out_shape=jax.ShapeDtypeStruct((B, TERMS_CLASSES), jnp.float32),
        in_specs=[pl.BlockSpec(memory_space=pltpu.MemorySpace.VMEM)] * 3,
        out_specs=pl.BlockSpec(memory_space=pltpu.MemorySpace.VMEM),
        cost_estimate=pl.CostEstimate(
            flops=flops,
            transcendentals=B * TERMS_CLASSES,
            bytes_accessed=bytes_accessed),
    )(x_flat, w_toep, fc_pack)


# --------------------------- deterministic params ----------------------------
def init_params(key):
    keys = iter(jax.random.split(key, 2 * len(KERNELS_TUPLE) + 2 * (FC_DEPTH + 1)))
    convs = []
    for (k, a), f in zip(KERNELS_TUPLE, FILTERS):
        # torch Conv2d weight layout: (F, 1, k, A)
        w = 0.1 * jax.random.normal(next(keys), (f, 1, k, a), jnp.float32)
        b = 0.1 * jax.random.normal(next(keys), (f,), jnp.float32)
        convs.append((w, b))
    sum_f = sum(FILTERS)
    fc = []
    din = sum_f
    for _ in range(FC_DEPTH):
        w = 0.1 * jax.random.normal(next(keys), (din, TERMS_CLASSES), jnp.float32)
        b = 0.1 * jax.random.normal(next(keys), (TERMS_CLASSES,), jnp.float32)
        fc.append((w, b))
        din = TERMS_CLASSES
    wo = 0.1 * jax.random.normal(next(keys), (din, TERMS_CLASSES), jnp.float32)
    bo = 0.1 * jax.random.normal(next(keys), (TERMS_CLASSES,), jnp.float32)
    return {"convs": convs, "fc": fc, "out": (wo, bo)}


# ------------------------------ reference (pure JAX) -------------------------
def model1_reference(x, params):
    B = x.shape[0]
    nets = []
    for (k, a), f, (w, b) in zip(KERNELS_TUPLE, FILTERS, params["convs"]):
        p_cnt = MAXLEN - k + 1
        w2 = w.reshape(f, k * a)                              # (F, k*A)
        outs = []
        for p in range(p_cnt):
            patch = x[:, p:p + k, :].reshape(B, k * a)        # (B, k*A), (t,a)-major
            outs.append(patch @ w2.T)                         # (B, F)
        conv = jnp.stack(outs, axis=1)                        # (B, P, F)
        nets.append(jnp.max(conv, axis=1) + b)                # global max pool + bias
    net = jnp.concatenate(nets, axis=1)
    for w, b in params["fc"]:
        net = jnp.maximum(net @ w + b, 0.0)
    wo, bo = params["out"]
    return jax.nn.sigmoid(net @ wo + bo)


# ---------------------------------- main --------------------------------------
if __name__ == "__main__":
    key = jax.random.PRNGKey(0)
    k_x, k_p = jax.random.split(key)
    B = 2
    x = jax.random.normal(k_x, (B, MAXLEN, ALPHABET), jnp.float32)
    params = init_params(k_p)
    w_toep, fc_pack, layout = pack_params(params)

    out = model1_forward(x, w_toep, fc_pack, layout)
    out = jax.block_until_ready(out)

    ref = model1_reference(x, params)
    assert out.shape == (B, TERMS_CLASSES)
    err = float(jnp.max(jnp.abs(out - ref)))
    assert err < 1e-4, f"mismatch vs pure-JAX reference: {err}"

    print("KERNEL_OK")
</pallas_src>

<mosaic_0001>
module attributes {stable_mosaic.version = 11 : i64} {
  func.func @_fused_kernel(%arg0: memref<2x128xf32, #tpu.memory_space<vmem>>, %arg1: memref<128x352xf32, #tpu.memory_space<vmem>>, %arg2: memref<120x32xf32, #tpu.memory_space<vmem>>, %arg3: memref<2x32xf32, #tpu.memory_space<vmem>>) attributes {dimension_semantics = [], scalar_prefetch = 0 : i64, scratch_operands = 0 : i64, tpu.core_type = #tpu.core_type<tc>} {
    %c0 = arith.constant 0 : index
    %c0_0 = arith.constant 0 : index
    %0 = vector.load %arg0[%c0, %c0_0] : memref<2x128xf32, #tpu.memory_space<vmem>>, vector<2x128xf32>
    %c0_1 = arith.constant 0 : index
    %c0_2 = arith.constant 0 : index
    %1 = vector.load %arg1[%c0_1, %c0_2] : memref<128x352xf32, #tpu.memory_space<vmem>>, vector<128x352xf32>
    %cst = arith.constant dense<0.000000e+00> : vector<2x352xf32>
    %2 = tpu.matmul %0, %1, %cst {dimension_numbers = #tpu.dot_dimension_numbers<[1], [0], [0], [1], [0, 0, 1, 1], [], []>} : vector<2x128xf32>, vector<128x352xf32>, vector<2x352xf32> -> vector<2x352xf32>
    %3 = vector.extract_strided_slice %2 {offsets = [0, 0], sizes = [2, 16], strides = [1, 1]} : vector<2x352xf32> to vector<2x16xf32>
    %4 = vector.extract_strided_slice %2 {offsets = [0, 16], sizes = [2, 16], strides = [1, 1]} : vector<2x352xf32> to vector<2x16xf32>
    %5 = vector.extract_strided_slice %2 {offsets = [0, 32], sizes = [2, 16], strides = [1, 1]} : vector<2x352xf32> to vector<2x16xf32>
    %6 = vector.extract_strided_slice %2 {offsets = [0, 48], sizes = [2, 16], strides = [1, 1]} : vector<2x352xf32> to vector<2x16xf32>
    %7 = vector.extract_strided_slice %2 {offsets = [0, 64], sizes = [2, 16], strides = [1, 1]} : vector<2x352xf32> to vector<2x16xf32>
    %8 = vector.extract_strided_slice %2 {offsets = [0, 80], sizes = [2, 16], strides = [1, 1]} : vector<2x352xf32> to vector<2x16xf32>
    %9 = vector.extract_strided_slice %2 {offsets = [0, 96], sizes = [2, 16], strides = [1, 1]} : vector<2x352xf32> to vector<2x16xf32>
    %10 = vector.extract_strided_slice %2 {offsets = [0, 112], sizes = [2, 16], strides = [1, 1]} : vector<2x352xf32> to vector<2x16xf32>
    %11 = vector.extract_strided_slice %2 {offsets = [0, 128], sizes = [2, 16], strides = [1, 1]} : vector<2x352xf32> to vector<2x16xf32>
    %12 = vector.extract_strided_slice %2 {offsets = [0, 144], sizes = [2, 16], strides = [1, 1]} : vector<2x352xf32> to vector<2x16xf32>
    %13 = vector.extract_strided_slice %2 {offsets = [0, 160], sizes = [2, 16], strides = [1, 1]} : vector<2x352xf32> to vector<2x16xf32>
    %14 = vector.extract_strided_slice %2 {offsets = [0, 176], sizes = [2, 16], strides = [1, 1]} : vector<2x352xf32> to vector<2x16xf32>
    %15 = vector.extract_strided_slice %2 {offsets = [0, 192], sizes = [2, 16], strides = [1, 1]} : vector<2x352xf32> to vector<2x16xf32>
    %16 = arith.maximumf %3, %4 : vector<2x16xf32>
    %17 = arith.maximumf %5, %6 : vector<2x16xf32>
    %18 = arith.maximumf %7, %8 : vector<2x16xf32>
    %19 = arith.maximumf %9, %10 : vector<2x16xf32>
    %20 = arith.maximumf %11, %12 : vector<2x16xf32>
    %21 = arith.maximumf %13, %14 : vector<2x16xf32>
    %22 = arith.maximumf %16, %17 : vector<2x16xf32>
    %23 = arith.maximumf %18, %19 : vector<2x16xf32>
    %24 = arith.maximumf %20, %21 : vector<2x16xf32>
    %25 = arith.maximumf %22, %23 : vector<2x16xf32>
    %26 = arith.maximumf %24, %15 : vector<2x16xf32>
    %27 = arith.maximumf %25, %26 : vector<2x16xf32>
    %c0_3 = arith.constant 0 : index
    %c0_4 = arith.constant 0 : index
    %28 = vector.load %arg2[%c0_3, %c0_4] : memref<120x32xf32, #tpu.memory_space<vmem>>, vector<16x32xf32>
    %cst_5 = arith.constant dense<0.000000e+00> : vector<2x32xf32>
    %29 = tpu.matmul %27, %28, %cst_5 {dimension_numbers = #tpu.dot_dimension_numbers<[1], [0], [0], [1], [0, 0, 1, 1], [], []>} : vector<2x16xf32>, vector<16x32xf32>, vector<2x32xf32> -> vector<2x32xf32>
    %30 = vector.extract_strided_slice %2 {offsets = [0, 208], sizes = [2, 16], strides = [1, 1]} : vector<2x352xf32> to vector<2x16xf32>
    %31 = vector.extract_strided_slice %2 {offsets = [0, 224], sizes = [2, 16], strides = [1, 1]} : vector<2x352xf32> to vector<2x16xf32>
    %32 = vector.extract_strided_slice %2 {offsets = [0, 240], sizes = [2, 16], strides = [1, 1]} : vector<2x352xf32> to vector<2x16xf32>
    %33 = vector.extract_strided_slice %2 {offsets = [0, 256], sizes = [2, 16], strides = [1, 1]} : vector<2x352xf32> to vector<2x16xf32>
    %34 = vector.extract_strided_slice %2 {offsets = [0, 272], sizes = [2, 16], strides = [1, 1]} : vector<2x352xf32> to vector<2x16xf32>
    %35 = vector.extract_strided_slice %2 {offsets = [0, 288], sizes = [2, 16], strides = [1, 1]} : vector<2x352xf32> to vector<2x16xf32>
    %36 = vector.extract_strided_slice %2 {offsets = [0, 304], sizes = [2, 16], strides = [1, 1]} : vector<2x352xf32> to vector<2x16xf32>
    %37 = vector.extract_strided_slice %2 {offsets = [0, 320], sizes = [2, 16], strides = [1, 1]} : vector<2x352xf32> to vector<2x16xf32>
    %38 = vector.extract_strided_slice %2 {offsets = [0, 336], sizes = [2, 16], strides = [1, 1]} : vector<2x352xf32> to vector<2x16xf32>
    %39 = arith.maximumf %30, %31 : vector<2x16xf32>
    %40 = arith.maximumf %32, %33 : vector<2x16xf32>
    %41 = arith.maximumf %34, %35 : vector<2x16xf32>
    %42 = arith.maximumf %36, %37 : vector<2x16xf32>
    %43 = arith.maximumf %39, %40 : vector<2x16xf32>
    %44 = arith.maximumf %41, %42 : vector<2x16xf32>
    %45 = arith.maximumf %43, %44 : vector<2x16xf32>
    %46 = arith.maximumf %45, %38 : vector<2x16xf32>
    %c16 = arith.constant 16 : index
    %c0_6 = arith.constant 0 : index
    %47 = vector.load %arg2[%c16, %c0_6] : memref<120x32xf32, #tpu.memory_space<vmem>>, vector<16x32xf32>
    %cst_7 = arith.constant dense<0.000000e+00> : vector<2x32xf32>
    %48 = tpu.matmul %46, %47, %cst_7 {dimension_numbers = #tpu.dot_dimension_numbers<[1], [0], [0], [1], [0, 0, 1, 1], [], []>} : vector<2x16xf32>, vector<16x32xf32>, vector<2x32xf32> -> vector<2x32xf32>
    %49 = arith.addf %29, %48 : vector<2x32xf32>
    %c96 = arith.constant 96 : index
    %c0_8 = arith.constant 0 : index
    %50 = vector.load %arg2[%c96, %c0_8] : memref<120x32xf32, #tpu.memory_space<vmem>>, vector<1x32xf32>
    %51 = vector.broadcast %50 : vector<1x32xf32> to vector<2x32xf32>
    %52 = arith.addf %49, %51 : vector<2x32xf32>
    %cst_9 = arith.constant 0.000000e+00 : f32
    %53 = vector.broadcast %cst_9 : f32 to vector<2x32xf32>
    %54 = arith.maximumf %52, %53 : vector<2x32xf32>
    %c32 = arith.constant 32 : index
    %c0_10 = arith.constant 0 : index
    %55 = vector.load %arg2[%c32, %c0_10] : memref<120x32xf32, #tpu.memory_space<vmem>>, vector<32x32xf32>
    %cst_11 = arith.constant dense<0.000000e+00> : vector<2x32xf32>
    %56 = tpu.matmul %54, %55, %cst_11 {dimension_numbers = #tpu.dot_dimension_numbers<[1], [0], [0], [1], [0, 0, 1, 1], [], []>} : vector<2x32xf32>, vector<32x32xf32>, vector<2x32xf32> -> vector<2x32xf32>
    %c104 = arith.constant 104 : index
    %c0_12 = arith.constant 0 : index
    %57 = vector.load %arg2[%c104, %c0_12] : memref<120x32xf32, #tpu.memory_space<vmem>>, vector<1x32xf32>
    %58 = vector.broadcast %57 : vector<1x32xf32> to vector<2x32xf32>
    %59 = arith.addf %56, %58 : vector<2x32xf32>
    %cst_13 = arith.constant 0.000000e+00 : f32
    %60 = vector.broadcast %cst_13 : f32 to vector<2x32xf32>
    %61 = arith.maximumf %59, %60 : vector<2x32xf32>
    %c64 = arith.constant 64 : index
    %c0_14 = arith.constant 0 : index
    %62 = vector.load %arg2[%c64, %c0_14] : memref<120x32xf32, #tpu.memory_space<vmem>>, vector<32x32xf32>
    %cst_15 = arith.constant dense<0.000000e+00> : vector<2x32xf32>
    %63 = tpu.matmul %61, %62, %cst_15 {dimension_numbers = #tpu.dot_dimension_numbers<[1], [0], [0], [1], [0, 0, 1, 1], [], []>} : vector<2x32xf32>, vector<32x32xf32>, vector<2x32xf32> -> vector<2x32xf32>
    %c112 = arith.constant 112 : index
    %c0_16 = arith.constant 0 : index
    %64 = vector.load %arg2[%c112, %c0_16] : memref<120x32xf32, #tpu.memory_space<vmem>>, vector<1x32xf32>
    %65 = vector.broadcast %64 : vector<1x32xf32> to vector<2x32xf32>
    %66 = arith.addf %63, %65 : vector<2x32xf32>
    %67 = arith.negf %66 : vector<2x32xf32>
    %68 = math.exp %67 : vector<2x32xf32>
    %cst_17 = arith.constant 1.000000e+00 : f32
    %69 = vector.broadcast %cst_17 : f32 to vector<2x32xf32>
    %70 = arith.addf %69, %68 : vector<2x32xf32>
    %71 = arith.divf %69, %70 : vector<2x32xf32>
    %c0_18 = arith.constant 0 : index
    %c0_19 = arith.constant 0 : index
    %72 = vector.load %arg3[%c0_18, %c0_19] : memref<2x32xf32, #tpu.memory_space<vmem>>, vector<2x32xf32>
    tpu.vector_store %arg3[%c0_18, %c0_19], %71 {strides = array<i32>} : memref<2x32xf32, #tpu.memory_space<vmem>>, vector<2x32xf32>,
    return
  }
}

</mosaic_0001>

<bundles_post_ra>
// kernel: tpu_custom_call.1
= control target key start
LH: loop header
LB: loop body
LE: loop exit
PB: predicated region body
PF: predicated region fallthrough
CT: control target
= control target key end

     0   :  { %v827_v3 = vmov 0.0|0.0   ;;  %vm828_vm0 = vmmov 0   ;;  %v829_v8 = vmov 0.0   ;;  %s1084_s0 = inlined_call_operand.vmem [shape: f32[2,128], index: 0, kind: input, shape index: {}]   ;;  %s1085_s1 = inlined_call_operand.vmem [shape: f32[128,352], index: 1, kind: input, shape index: {}]   ;;  %s1086_s2 = inlined_call_operand.vmem [shape: f32[120,32], index: 2, kind: input, shape index: {}]   ;;  %s1087_s3 = inlined_call_operand.hbm [shape: f32[2,32], index: 3, kind: output, shape index: {}]  }
   0x1   :  { %v18_v0 = vld [vmem:[%s1085_s1 + $0x10] sm:$0xff]  ;;  %v21_v1 = vld [vmem:[%s1085_s1 + $0x28] sm:$0xff]  ;;  %749 = vmatprep.subr.bf16.mxu1 %v827_v3  ;;  %v20_v5 = vld [vmem:[%s1085_s1 + $0x20] sm:$0xff]  ;;  %678 = vmatprep.mubr.msk.f32.mxu1 %vm828_vm0, %v829_v8 }
   0x2   :  { %v17_v2 = vld [vmem:[%s1085_s1 + $0x8] sm:$0xff]  ;;  %v750_v4 = vpack.c.bf16 %v21_v1, %v18_v0  ;;  %v16_v6 = vld [vmem:[%s1085_s1] sm:$0xff]  ;;  %v19_v7 = vld [vmem:[%s1085_s1 + $0x18] sm:$0xff]  ;;  %128 = vmatprep.mubr.f32.mxu0 %v829_v8 }
   0x3   :  { %v717_v9 = vpack.c.bf16 %v20_v5, %v17_v2  ;;  %v719_v10 = vpack.c.bf16 %v19_v7, %v16_v6  ;;  %v24_v11 = vld [vmem:[%s1085_s1 + $0x40] sm:$0xff]  ;;  %v27_v12 = vld [vmem:[%s1085_s1 + $0x58] sm:$0xff]  ;;  %v26_v15 = vld [vmem:[%s1085_s1 + $0x50] sm:$0xff] }
   0x4   :  { %v23_v13 = vld [vmem:[%s1085_s1 + $0x38] sm:$0xff]  ;;  %751 = vmatpush3.bf16.msra.mxu1 %v750_v4  ;;  %v753_v14 = vpack.c.bf16 %v27_v12, %v24_v11  ;;  %v22_v16 = vld [vmem:[%s1085_s1 + $0x30] sm:$0xff]  ;;  %v25_v17 = vld [vmem:[%s1085_s1 + $0x48] sm:$0xff] }
   0x5   :  { %718 = vmatprep.subr.bf16.mxu0 %v717_v9  ;;  %752 = vmatprep.subr.bf16.mxu1 %v827_v3  ;;  %v721_v18 = vpack.c.bf16 %v26_v15, %v23_v13  ;;  %v30_v19 = vld [vmem:[%s1085_s1 + $0x70] sm:$0xff]  ;;  %v33_v20 = vld [vmem:[%s1085_s1 + $0x88] sm:$0xff]  ;;  %v723_v22 = vpack.c.bf16 %v25_v17, %v22_v16  ;;  %v32_v23 = vld [vmem:[%s1085_s1 + $0x80] sm:$0xff] }
   0x6   :  { %v29_v21 = vld [vmem:[%s1085_s1 + $0x68] sm:$0xff]  ;;  %720 = vmatpush1.bf16.msra.mxu0 %v719_v10  ;;  %v28_v25 = vld [vmem:[%s1085_s1 + $0x60] sm:$0xff]  ;;  %v31_v26 = vld [vmem:[%s1085_s1 + $0x78] sm:$0xff]  ;;  %v756_v27 = vpack.c.bf16 %v33_v20, %v30_v19 }
   0x7   :  { %722 = vmatprep.subr.bf16.mxu0 %v721_v18  ;;  %v725_v24 = vpack.c.bf16 %v32_v23, %v29_v21  ;;  %v35_v28 = vld [vmem:[%s1085_s1 + $0x98] sm:$0xff]  ;;  %v38_v29 = vld [vmem:[%s1085_s1 + $0xb0] sm:$0xff]  ;;  %v36_v30 = vld [vmem:[%s1085_s1 + $0xa0] sm:$0xff]  ;;  %v727_v32 = vpack.c.bf16 %v31_v26, %v28_v25 }
   0x8   :  { %754 = vmatpush3.bf16.msra.mxu1 %v753_v14  ;;  %v39_v31 = vld [vmem:[%s1085_s1 + $0xb8] sm:$0xff]  ;;  %v729_v33 = vpack.c.bf16 %v38_v29, %v35_v28  ;;  %v34_v34 = vld [vmem:[%s1085_s1 + $0x90] sm:$0xff]  ;;  %v37_v35 = vld [vmem:[%s1085_s1 + $0xa8] sm:$0xff] }
   0x9   :  { %755 = vmatprep.subr.bf16.mxu1 %v827_v3  ;;  %v759_v36 = vpack.c.bf16 %v39_v31, %v36_v30  ;;  %v41_v37 = vld [vmem:[%s1085_s1 + $0xc8] sm:$0xff]  ;;  %v44_v38 = vld [vmem:[%s1085_s1 + $0xe0] sm:$0xff]  ;;  %v42_v39 = vld [vmem:[%s1085_s1 + $0xd0] sm:$0xff]  ;;  %v731_v41 = vpack.c.bf16 %v37_v35, %v34_v34 }
   0xa   :  { %724 = vmatpush1.bf16.msra.mxu0 %v723_v22  ;;  %v45_v40 = vld [vmem:[%s1085_s1 + $0xe8] sm:$0xff]  ;;  %v733_v42 = vpack.c.bf16 %v44_v38, %v41_v37  ;;  %v40_v43 = vld [vmem:[%s1085_s1 + $0xc0] sm:$0xff]  ;;  %v43_v44 = vld [vmem:[%s1085_s1 + $0xd8] sm:$0xff] }
   0xb   :  { %726 = vmatprep.subr.bf16.mxu0 %v725_v24  ;;  %v762_v45 = vpack.c.bf16 %v45_v40, %v42_v39  ;;  %v47_v46 = vld [vmem:[%s1085_s1 + $0xf8] sm:$0xff]  ;;  %v50_v47 = vld [vmem:[%s1085_s1 + $0x110] sm:$0xff]  ;;  %v48_v48 = vld [vmem:[%s1085_s1 + $0x100] sm:$0xff] }
   0xc   :  { %757 = vmatpush3.bf16.msra.mxu1 %v756_v27  ;;  %v51_v49 = vld [vmem:[%s1085_s1 + $0x118] sm:$0xff] }
   0xd   :  { %758 = vmatprep.subr.bf16.mxu1 %v827_v3 }
   0xe   :  { %728 = vmatpush1.bf16.msra.mxu0 %v727_v32 }
   0xf   :  { %730 = vmatprep.subr.bf16.mxu0 %v729_v33 }
  0x10   :  { %760 = vmatpush3.bf16.msra.mxu1 %v759_v36 }
  0x11   :  { %761 = vmatprep.subr.bf16.mxu1 %v827_v3 }
  0x12   :  { %8 = vsyncpa [#allocation3], 0  ;;  %732 = vmatpush1.bf16.msra.mxu0 %v731_v41  ;;  %v735_v50 = vpack.c.bf16 %v43_v44, %v40_v43  ;;  %v737_v51 = vpack.c.bf16 %v50_v47, %v47_v46  ;;  %v46_v52 = vld [vmem:[%s1085_s1 + $0xf0] sm:$0xff]  ;;  %v49_v53 = vld [vmem:[%s1085_s1 + $0x108] sm:$0xff]  ;;  %v765_v54 = vpack.c.bf16 %v51_v49, %v48_v48  ;;  %s832_s10 = smov 64   ;;  %s833_s11 = smov 48  }
  0x13   :  { %734 = vmatprep.subr.bf16.mxu0 %v733_v42  ;;  %v53_v55 = vld [vmem:[%s1085_s1 + $0x128] sm:$0xff]  ;;  %v56_v56 = vld [vmem:[%s1085_s1 + $0x140] sm:$0xff]  ;;  %v54_v57 = vld [vmem:[%s1085_s1 + $0x130] sm:$0xff]  ;;  %v739_v59 = vpack.c.bf16 %v49_v53, %v46_v52  ;;  %vm264_vm1 = vcmask 130048   ;;  %vm426_vm2 = vcmask 261120   ;;  %s834_s5 = smov [#allocation2]  }
  0x14   :  { %763 = vmatpush3.bf16.msra.mxu1 %v762_v45  ;;  %v57_v58 = vld [vmem:[%s1085_s1 + $0x148] sm:$0xff]  ;;  %v741_v60 = vpack.c.bf16 %v56_v56, %v53_v55  ;;  %v52_v61 = vld [vmem:[%s1085_s1 + $0x120] sm:$0xff]  ;;  %v55_v62 = vld [vmem:[%s1085_s1 + $0x138] sm:$0xff]  ;;  %s597_s6 = sshll.u32 %s834_s5, 4  ;;  %vm589_vm3 = vcmask 254976   ;;  %s598_s6 = int_to_ptr.vmem [resolvable:$true] %s597_s6 }
  0x15   :  { %764 = vmatprep.subr.bf16.mxu1 %v827_v3  ;;  %v768_v63 = vpack.c.bf16 %v57_v58, %v54_v57  ;;  %v59_v0 = vld [vmem:[%s1085_s1 + $0x158] sm:$0xff]  ;;  %v62_v1 = vld [vmem:[%s1085_s1 + $0x170] sm:$0xff]  ;;  %v60_v2 = vld [vmem:[%s1085_s1 + $0x160] sm:$0xff]  ;;  %v743_v5 = vpack.c.bf16 %v55_v62, %v52_v61  ;;  %s803_s7 = scalar_lea.vmem %s598_s6, 32  ;;  %p808_p1 = scmp.lt.s32.totalorder %s598_s6, %s598_s6 }
  0x16   :  { %736 = vmatpush1.bf16.msra.mxu0 %v735_v50  ;;  %v63_v4 = vld [vmem:[%s1085_s1 + $0x178] sm:$0xff]  ;;  %v745_v6 = vpack.c.bf16 %v62_v1, %v59_v0  ;;  %v58_v7 = vld [vmem:[%s1085_s1 + $0x150] sm:$0xff]  ;;  %v61_v9 = vld [vmem:[%s1085_s1 + $0x168] sm:$0xff]  ;;  %s830_s1 = smov 112   ;;  %p804_p0 = scmp.ne.s32.totalorder %s598_s6, %s803_s7 }
  0x17   :  { %738 = vmatprep.subr.bf16.mxu0 %v737_v51  ;;  %v771_v10 = vpack.c.bf16 %v63_v4, %v60_v2  ;;  %v747_v11 = vpack.c.bf16 %v61_v9, %v58_v7  ;;  %v15_v12 = vld [vmem:[%s1084_s0] sm:$0x3]  ;;  %s831_s0 = smov 96   ;;  %v236_v23 = vld [vmem:[%s1086_s2 + $0x8] sm:$0xff]  ;;  %v259_v27 = vld [vmem:[%s1086_s2 + $0x10] sm:$0xff]  ;;  %p809_p2 = scmp.lt.s32.totalorder %s803_s7, %s803_s7 }
  0x18   :  { %766 = vmatpush3.bf16.msra.mxu1 %v765_v54  ;;  %v235_v22 = vld [vmem:[%s1086_s2] sm:$0xff]  ;;  %v260_v28 = vld [vmem:[%s1086_s2 + $0x18] sm:$0xff]  ;;  %v418_v48 = vld [vmem:[%s1086_s2 + $0x28] sm:$0xff] }
  0x19   :  { %767 = vmatprep.subr.bf16.mxu1 %v827_v3  ;;  %v777_v24 = vpack.c.bf16 %v236_v23, %v235_v22  ;;  %v774_v29 = vpack.c.bf16 %v260_v28, %v259_v27  ;;  %v417_v47 = vld [vmem:[%s1086_s2 + $0x20] sm:$0xff]  ;;  %v419_v50 = vld [vmem:[%s1086_s2 + $0x30] sm:$0xff]  ;;  %v502_v53 = vld [vmem:[%s1086_s2 + $0x48] sm:$0xff]  ;;  %p810_p3 = por %p809_p2, %p808_p1 }
  0x1a   :  { %740 = vmatpush1.bf16.msra.mxu0 %v739_v59  ;;  %v780_v49 = vpack.c.bf16 %v418_v48, %v417_v47  ;;  %v501_v52 = vld [vmem:[%s1086_s2 + $0x40] sm:$0xff]  ;;  %v608_v1 = vld [vmem:[%s1086_s2 + $0x68] ss:$0 sm:$0xff]  ;;  %v610_v7 = vld [vmem:[%s1086_s2 + $0x70] ss:$0 sm:$0xff] }
  0x1b   :  { %742 = vmatprep.subr.bf16.mxu0 %v741_v60  ;;  %v786_v54 = vpack.c.bf16 %v502_v53, %v501_v52  ;;  %v607_v58 = vld [vmem:[%s1086_s2 + $0x60] ss:$0 sm:$0xff]  ;;  %p811_p4 = pnand %p810_p3, %p804_p0 }
  0x1c   :  { %769 = vmatpush3.bf16.msra.mxu1 %v768_v63  ;;  %v503_v63 = vld [vmem:[%s1086_s2 + $0x50] sm:$0xff] }
  0x1d   :  { %770 = vmatprep.subr.bf16.mxu1 %v827_v3 }
  0x1e   :  { %744 = vmatpush1.bf16.msra.mxu0 %v743_v5 }
  0x1f   :  { %746 = vmatprep.subr.bf16.mxu0 %v745_v6 }
  0x20   :  { %772 = vmatpush3.bf16.msra.mxu1 %v771_v10 }
  0x21   :  { %776 = vmatprep.subr.bf16.mxu1 %v827_v3 }
  0x22   :  { %748 = vmatpush1.bf16.msra.mxu0 %v747_v11 }
  0x23   :  { %679 = vmatmul.mubr.f32.vlgmr.msra.gmra.mrb[0].mxu1 %v15_v12  ;;  %773 = vmatprep.subr.bf16.mxu0 %v827_v3 }
  0x24   :  { %692 = vmatprep.mubr.msk.f32.mxu1 %vm828_vm0, %v829_v8  ;;  %778 = vmatpush3.bf16.msra.mxu1 %v777_v24 }
  0x25   :  { %129 = vmatmul.mubr.f32.vlgmr.msra.gmra.mrb[0].mxu0 %v15_v12  ;;  %785 = vmatprep.subr.bf16.mxu1 %v827_v3 }
  0x26   :  { %685 = vmatprep.mubr.msk.f32.mxu0 %vm828_vm0, %v829_v8  ;;  %775 = vmatpush3.bf16.msra.mxu0 %v774_v29 }
  0x27   :  { %779 = vmatprep.subr.bf16.mxu0 %v827_v3 }
  0xf6   :  { %v201_v13 = vpop.f32.mrb[0].mxu1 }
  0xf7   :  { %238 = vrot.lane.b32.xlu0 %v201_v13, %s830_s1  ;;  %v680_v14 = vpop.f32.mrb[1].mxu1 }
  0xf8   :  { %v130_v15 = vpop.f32.mrb[0].mxu0 }
  0xf9   :  { %v132_v16 = vpop.f32.mrb[1].mxu0 }
  0xfb   :  { %206 = vrot.lane.b32.xlu0 %v130_v15, %s830_s1 }
 0x169   :  { %v239_v17 = vpop.permute.xlu0 %238 }
 0x16a   :  { %v242_v18 = vmax.f32 %v201_v13, %v239_v17  ;;  %v241_v21 = vmax.f32 %v132_v16, %v239_v17 }
 0x16c   :  { %249 = vrot.lane.b32.xlu1 %v242_v18, %s831_s0 }
 0x16d   :  { %v207_v19 = vpop.permute.xlu0 %206 }
 0x16e   :  { %v209_v20 = vmax.f32 %v130_v15, %v207_v19 }
 0x170   :  { %216 = vrot.lane.b32.xlu0 %v209_v20, %s831_s0  ;;  %211 = vrot.lane.b32.xlu1 %v132_v16, %s830_s1 }
 0x174   :  { %244 = vrot.lane.b32.xlu1 %v241_v21, %s831_s0 }
 0x1de   :  { %v250_v25 = vpop.permute.xlu1 %249 }
 0x1df   :  { %v252_v26 = vmax.f32 %v242_v18, %v250_v25 }
 0x1e1   :  { %254 = vrot.lane.b32.xlu0 %v252_v26, %s832_s10 }
 0x1e2   :  { %v217_v30 = vpop.permute.xlu0 %216  ;;  %v212_v31 = vpop.permute.xlu1 %211 }
 0x1e3   :  { %v219_v32 = vmax.f32 %v209_v20, %v217_v30  ;;  %v214_v33 = vmax.f32 %v132_v16, %v212_v31 }
 0x1e5   :  { %226 = vrot.lane.b32.xlu0 %v219_v32, %s832_s10  ;;  %221 = vrot.lane.b32.xlu1 %v214_v33, %s831_s0 }
 0x1e6   :  { %v245_v34 = vpop.permute.xlu1 %244 }
 0x1e7   :  { %v247_v35 = vmax.f32 %v214_v33, %v245_v34 }
 0x1e9   :  { %230 = vrot.lane.b32.xlu1 %v132_v16, %s832_s10 }
 0x253   :  { %v255_v36 = vpop.permute.xlu0 %254 }
 0x254   :  { %v257_v37 = vmax.f32 %v247_v35, %v255_v36 }
 0x256   :  { %v258_v38 = vmax.f32 %v257_v37, %v201_v13 }
 0x257   :  { %v222_v39 = vpop.permute.xlu1 %221  ;;  %v227_v40 = vpop.permute.xlu0 %226 }
 0x258   :  { %262 = vrot.lane.b32.xlu0 %v258_v38, %s833_s11  ;;  %v224_v41 = vmax.f32 %v214_v33, %v222_v39  ;;  %v229_v43 = vmax.f32 %v219_v32, %v227_v40 }
 0x25b   :  { %v231_v42 = vpop.permute.xlu1 %230 }
 0x25c   :  { %v233_v44 = vmax.f32 %v224_v41, %v231_v42 }
 0x25e   :  { %v234_v45 = vmax.f32 %v229_v43, %v233_v44 }
 0x260   :  { %693 = vmatmul.mubr.msk.f32.vlgmr.msra.gmra.mrb[2].mxu1 %vm264_vm1, %v234_v45 }
 0x261   :  { %714 = vmatprep.mubr.msk.f32.mxu1 %vm828_vm0, %v829_v8  ;;  %787 = vmatpush3.bf16.msra.mxu1 %v786_v54 }
 0x262   :  { %788 = vmatprep.subr.bf16.mxu1 %v827_v3 }
 0x2ca   :  { %v263_v46 = vpop.permute.xlu0 %262 }
 0x2cb   :  { %686 = vmatmul.mubr.msk.f32.vlgmr.msra.gmra.mrb[2].mxu0 %vm264_vm1, %v263_v46 }
 0x2cc   :  { %703 = vmatprep.mubr.msk.f32.mxu0 %vm828_vm0, %v829_v8  ;;  %781 = vmatpush3.bf16.msra.mxu0 %v780_v49  ;;  %v420_v8 = vld [vmem:[%s1086_s2 + $0x38] sm:$0xff] }
 0x2cd   :  { %782 = vmatprep.subr.bf16.mxu0 %v827_v3  ;;  %v783_v51 = vpack.c.bf16 %v420_v8, %v419_v50  ;;  %v504_v3 = vld [vmem:[%s1086_s2 + $0x58] sm:$0xff] }
 0x2ce   :  { %v789_v0 = vpack.c.bf16 %v504_v3, %v503_v63 }
 0x2d0   :  { %784 = vmatpush3.bf16.msra.mxu0 %v783_v51  ;;  %790 = vmatpush3.bf16.msra.mxu1 %v789_v0 }
 0x333   :  { %v406_v55 = vpop.f32.mrb[2].mxu1 }
 0x334   :  { %v694_v56 = vpop.f32.mrb[3].mxu1 }
 0x39e   :  { %v333_v57 = vpop.f32.mrb[2].mxu0 }
 0x39f   :  { %v407_v59 = vadd.f32 %v406_v55, %v333_v57  ;;  %v687_v60 = vpop.f32.mrb[3].mxu0 }
 0x3a1   :  { %v415_v61 = vadd.f32 %v607_v58, %v407_v59 }
 0x3a3   :  { %v416_v62 = vmax.f32 %v415_v61, 0.0 }
 0x3a5   :  { %704 = vmatmul.mubr.msk.f32.vlgmr.msra.gmra.mrb[4].mxu0 %vm426_vm2, %v416_v62 }
 0x478   :  { %v496_v2 = vpop.f32.mrb[4].mxu0 }
 0x479   :  { %v497_v4 = vadd.f32 %v608_v1, %v496_v2  ;;  %v705_v5 = vpop.f32.mrb[5].mxu0 }
 0x47b   :  { %v500_v6 = vmax.f32 %v497_v4, 0.0 }
 0x47d   :  { %715 = vmatmul.mubr.msk.f32.vlgmr.msra.gmra.mrb[4].mxu1 %vm426_vm2, %v500_v6 }
 0x550   :  { %v579_v9 = vpop.f32.mrb[4].mxu1 }
 0x551   :  { %v580_v10 = vadd.f32 %v610_v7, %v579_v9  ;;  %v716_v11 = vpop.f32.mrb[5].mxu1 }
 0x553   :  { %v612_v12 = vmul.f32 -1.442695, %v580_v10 }
 0x555   :  { %799 = vpow2.f32 %v612_v12 }
 0x55f   :  { %v800_v13 = vpop.eup %799 }
 0x560   :  { %v586_v14 = vadd.f32 1.0, %v800_v13 }
 0x562   :  { %801 = vrcp.f32 %v586_v14 }
 0x56c   :  { %v802_v15 = vpop.eup %801 }
 0x56d   :  { %590 = vst.msk [vmem:[#allocation2] sm:$0x3] %vm589_vm3, %v802_v15 }
 0x56e   :  { %814 = shalt.err (!%p811_p4)
}
 0x56f   :  { %s815_s9 = scalar_lea.hbm %s1087_s3, 32 }
 0x570   :  { %p816_p5 = scmp.ne.s32.totalorder %s1087_s3, %s815_s9  ;;  %p819_p6 = scmp.lt.u32.totalorder %s815_s9, %s1087_s3 }
 0x572   :  { %p821_p7 = pnand %p819_p6, %p816_p5 }
 0x574   :  { %824 = shalt.err (!%p821_p7)
}
 0x575   :  { %600 = dma.vmem_to_hbm [thread:$0]  %s598_s6, 32, %s1087_s3, [#allocation3]  }
 0x576   :  { %825 = dma.done.wait [#allocation3], 32  }
 0x577   :  { %826 = vsyncadd [#allocation3], 4294967264 }
 0x578   :  { %604 = vsyncpa [#allocation3], 1 }

</bundles_post_ra>
